<compile_context>
chip_gen: v7x
topology: tpu7x:2x2x1
jax: 0.10.0
libtpu: 0.0.40
codegen_flags: <defaults>
</compile_context>

<pallas_src>
import functools

import jax
import jax.numpy as jnp
from jax import lax
from jax.experimental import pallas as pl
from jax.experimental.pallas import tpu as pltpu

_BN_EPS = 1e-5
_LANES = 128
_N_ATTN = 13  # folded attention coefficients in the SMEM params vector


# --------------------------------------------------------------------------
# shared in-kernel helpers
# --------------------------------------------------------------------------
def _attn_shifted(p_ref, x0, x1):
    """Shifted attention outputs p_i = o_i - o_i(mu), from folded scalars.

    Coefficient layout (SMEM):
      0 Aq0  1 Bq0  2 Aq1  3 Bq1          (bn1 folded into q)
      4 Ak0  5 -Ak1 6 Bk0-Bk1             (k0 - k1)
      7 Av0  8 -Av1 9 Bv0-Bv1             (v0 - v1, out_proj folded)
      10 Av1 11 Bv1-shift0 12 Bv1-shift1  (V1 minus per-query mean shift)
    """
    q0 = x0 * p_ref[0] + p_ref[1]
    q1 = x1 * p_ref[2] + p_ref[3]
    dk = x0 * p_ref[4] + (x1 * p_ref[5] + p_ref[6])        # k0 - k1
    w0 = jax.nn.sigmoid(q0 * dk)                           # softmax([s0,s1])[0]
    w1 = jax.nn.sigmoid(q1 * dk)
    dv = x0 * p_ref[7] + (x1 * p_ref[8] + p_ref[9])        # v0 - v1
    v1a = x1 * p_ref[10]
    p0 = (v1a + p_ref[11]) + w0 * dv                       # o0 - shift0
    p1 = (v1a + p_ref[12]) + w1 * dv                       # o1 - shift1
    return p0, p1


def _accum(acc_ref, p0, p1):
    # single merged (4,128) read-modify-write instead of 4 sublane RMWs
    part = jnp.concatenate(
        [jnp.sum(p0, axis=0, keepdims=True),
         jnp.sum(p0 * p0, axis=0, keepdims=True),
         jnp.sum(p1, axis=0, keepdims=True),
         jnp.sum(p1 * p1, axis=0, keepdims=True)],
        axis=0)                                            # (4, 128)
    acc_ref[0:4, :] = acc_ref[0:4, :] + part


def _accum_tile(acc_ref, p0, p1, tile, *, tile_rows, num_tiles, last_valid):
    """Accumulate bn2 stats; mask padded lanes (last tile only)."""
    if last_valid == tile_rows * _LANES:        # static: no padding anywhere
        _accum(acc_ref, p0, p1)
        return

    last = num_tiles - 1

    @pl.when(tile != last)
    def _full():                                 # interior tiles: no mask work
        _accum(acc_ref, p0, p1)

    @pl.when(tile == last)
    def _masked():
        flat = (lax.broadcasted_iota(jnp.int32, (tile_rows, _LANES), 0) * _LANES
                + lax.broadcasted_iota(jnp.int32, (tile_rows, _LANES), 1))
        valid = flat < last_valid                # static bound
        _accum(acc_ref, jnp.where(valid, p0, 0.0), jnp.where(valid, p1, 0.0))


# --------------------------------------------------------------------------
# fused single-call kernel (x read once, o-cache in VMEM, output written once)
# --------------------------------------------------------------------------
def _make_fused_kernel(*, tile_rows, num_tiles, last_valid):
    def kernel(p_ref, x1_ref, x2_ref, o_ref, acc_ref, c0_ref, c1_ref):
        phase = pl.program_id(0)
        tile = pl.program_id(1)
        row0 = pl.multiple_of(tile * tile_rows, 8)

        @pl.when(jnp.logical_and(phase == 0, tile == 0))
        def _init():
            acc_ref[...] = jnp.zeros_like(acc_ref)

        # ---- phase 0: attention, cache p0/p1, accumulate bn2 statistics ----
        @pl.when(phase == 0)
        def _stats():
            p0, p1 = _attn_shifted(p_ref, x1_ref[...], x2_ref[...])
            c0_ref[pl.ds(row0, tile_rows), :] = p0
            c1_ref[pl.ds(row0, tile_rows), :] = p1
            _accum_tile(acc_ref, p0, p1, tile, tile_rows=tile_rows,
                        num_tiles=num_tiles, last_valid=last_valid)

        # ---- phase 1: fold bn2+fc1 once, apply from cache, store output ----
        @pl.when(phase == 1)
        def _apply():
            @pl.when(tile == 0)
            def _fold():
                inv_b = p_ref[13]
                sums = jnp.sum(acc_ref[0:4, :], axis=1, keepdims=True)  # (4,1)
                mp0 = sums[0:1, :] * inv_b
                ep0 = sums[1:2, :] * inv_b
                mp1 = sums[2:3, :] * inv_b
                ep1 = sums[3:4, :] * inv_b
                s0 = lax.rsqrt(ep0 - mp0 * mp0 + _BN_EPS) * p_ref[14]   # g2_0
                s1 = lax.rsqrt(ep1 - mp1 * mp1 + _BN_EPS) * p_ref[15]   # g2_1
                cc0 = s0 * p_ref[18]                                    # wfc0
                cc1 = s1 * p_ref[19]                                    # wfc1
                dd = ((p_ref[16] - mp0 * s0) * p_ref[18]
                      + (p_ref[17] - mp1 * s1) * p_ref[19] + p_ref[20])
                acc_ref[4:5, :] = jnp.broadcast_to(cc0, (1, _LANES))
                acc_ref[5:6, :] = jnp.broadcast_to(cc1, (1, _LANES))
                acc_ref[6:7, :] = jnp.broadcast_to(dd, (1, _LANES))

            c0 = acc_ref[4:5, :]
            c1 = acc_ref[5:6, :]
            d = acc_ref[6:7, :]
            p0 = c0_ref[pl.ds(row0, tile_rows), :]
            p1 = c1_ref[pl.ds(row0, tile_rows), :]
            o_ref[...] = jax.nn.sigmoid(p0 * c0 + p1 * c1 + d)

    return kernel


# --------------------------------------------------------------------------
# streaming fallback kernels (stats pass + parallel apply pass)
# --------------------------------------------------------------------------
def _make_stats_kernel(*, tile_rows, num_tiles, last_valid):
    def kernel(p_ref, x1_ref, x2_ref, acc_ref):
        tile = pl.program_id(0)

        @pl.when(tile == 0)
        def _init():
            acc_ref[...] = jnp.zeros_like(acc_ref)

        p0, p1 = _attn_shifted(p_ref, x1_ref[...], x2_ref[...])
        _accum_tile(acc_ref, p0, p1, tile, tile_rows=tile_rows,
                    num_tiles=num_tiles, last_valid=last_valid)

    return kernel


def _apply_kernel(p_ref, x1_ref, x2_ref, o_ref):
    p0, p1 = _attn_shifted(p_ref, x1_ref[...], x2_ref[...])
    o_ref[...] = jax.nn.sigmoid(p0 * p_ref[13] + p1 * p_ref[14] + p_ref[15])


# --------------------------------------------------------------------------
# wrapper-side parameter folding
# --------------------------------------------------------------------------
def _fold_attn_params(p, mu0, var0, mu1, var1):
    """bn1 (exact batch stats) + q/k/v/out_proj folded into 13 scalars."""
    g1_0, g1_1, be1_0, be1_1 = p[0], p[1], p[2], p[3]
    wq, wk, wv = p[4], p[5], p[6]
    bq, bk, bv = p[7], p[8], p[9]
    wo, bo = p[10], p[11]

    a0 = lax.rsqrt(var0 + _BN_EPS) * g1_0
    a1 = lax.rsqrt(var1 + _BN_EPS) * g1_1
    c0 = be1_0 - mu0 * a0
    c1 = be1_1 - mu1 * a1

    aq0, bq0 = a0 * wq, c0 * wq + bq
    aq1, bq1 = a1 * wq, c1 * wq + bq
    ak0, bk0 = a0 * wk, c0 * wk + bk
    ak1, bk1 = a1 * wk, c1 * wk + bk
    av0, bv0 = a0 * wv * wo, (c0 * wv + bv) * wo + bo
    av1, bv1 = a1 * wv * wo, (c1 * wv + bv) * wo + bo

    # shift = attention output evaluated at the batch means (x0=mu0, x1=mu1);
    # subtracting it before accumulating kills E[x^2]-E[x]^2 cancellation.
    q0m = mu0 * aq0 + bq0
    q1m = mu1 * aq1 + bq1
    dkm = (mu0 * ak0 + bk0) - (mu1 * ak1 + bk1)
    v0m = mu0 * av0 + bv0
    v1m = mu1 * av1 + bv1
    dvm = v0m - v1m
    sh0 = v1m + jax.nn.sigmoid(q0m * dkm) * dvm
    sh1 = v1m + jax.nn.sigmoid(q1m * dkm) * dvm

    return jnp.stack([aq0, bq0, aq1, bq1,
                      ak0, -ak1, bk0 - bk1,
                      av0, -av1, bv0 - bv1,
                      av1, bv1 - sh0, bv1 - sh1])


def _round_up(x, m):
    return (x + m - 1) // m * m


def _vmem_capacity_bytes():
    try:
        cap = int(getattr(pltpu.get_tpu_info(), "vmem_capacity_bytes", 0))
        if cap > 0:
            return cap
    except Exception:
        pass
    return 64 << 20   # conservative default (v7x physical VMEM per TC)


# --------------------------------------------------------------------------
# forward
# --------------------------------------------------------------------------
@functools.partial(
    jax.jit,
    static_argnames=("batch", "tile_rows", "num_tiles", "fused", "vmem_limit"))
def _forward(x1f, x2f, raw_p, *, batch, tile_rows, num_tiles, fused, vmem_limit):
    rows_p = tile_rows * num_tiles
    batch_p = rows_p * _LANES
    last_valid = batch - (num_tiles - 1) * tile_rows * _LANES
    inv_b = jnp.float32(1.0 / batch)

    # bn1 batch statistics: exact two-pass, fused into the packing ops by XLA.
    mu0 = jnp.mean(x1f)
    var0 = jnp.mean(jnp.square(x1f - mu0))
    mu1 = jnp.mean(x2f)
    var1 = jnp.mean(jnp.square(x2f - mu1))
    attn_p = _fold_attn_params(raw_p, mu0, var0, mu1, var1)

    pad = batch_p - batch
    x1p = jnp.pad(x1f, (0, pad)).reshape(rows_p, _LANES)
    x2p = jnp.pad(x2f, (0, pad)).reshape(rows_p, _LANES)

    smem_spec = pl.BlockSpec(memory_space=pltpu.MemorySpace.SMEM)
    x_spec_1d = pl.BlockSpec((tile_rows, _LANES), lambda t: (t, 0))

    if fused:
        params = jnp.concatenate([
            attn_p,
            jnp.stack([inv_b, raw_p[12], raw_p[13], raw_p[14], raw_p[15],
                       raw_p[16], raw_p[17], raw_p[18]]),
        ])
        kernel = _make_fused_kernel(tile_rows=tile_rows, num_tiles=num_tiles,
                                    last_valid=last_valid)
        out = pl.pallas_call(
            kernel,
            out_shape=jax.ShapeDtypeStruct((rows_p, _LANES), jnp.float32),
            grid_spec=pltpu.PrefetchScalarGridSpec(
                num_scalar_prefetch=0,
                grid=(2, num_tiles),                          # (phase, tile)
                in_specs=[
                    smem_spec,
                    # x is streamed once (phase 0); phase 1 pins block 0 so x
                    # is not re-fetched from HBM.
                    pl.BlockSpec((tile_rows, _LANES),
                                 lambda p, t: (t * (1 - p), 0)),
                    pl.BlockSpec((tile_rows, _LANES),
                                 lambda p, t: (t * (1 - p), 0)),
                ],
                # output block index frozen at 0 during the stats phase -> no
                # garbage tiles are ever written back to HBM.
                out_specs=pl.BlockSpec((tile_rows, _LANES),
                                       lambda p, t: (t * p, 0)),
                scratch_shapes=[
                    pltpu.VMEM((8, _LANES), jnp.float32),      # stats + coeffs
                    pltpu.VMEM((rows_p, _LANES), jnp.float32),  # p0 cache
                    pltpu.VMEM((rows_p, _LANES), jnp.float32),  # p1 cache
                ],
            ),
            compiler_params=pltpu.CompilerParams(
                # accumulator + cache shared across both axes -> sequential
                dimension_semantics=("arbitrary", "arbitrary"),
                vmem_limit_bytes=vmem_limit,
            ),
            cost_estimate=pl.CostEstimate(
                flops=30 * batch_p, transcendentals=3 * batch_p,
                bytes_accessed=12 * batch_p),
        )(params, x1p, x2p)
    else:
        # -------- streaming fallback: stats call + parallel apply call -----
        stats_kernel = _make_stats_kernel(tile_rows=tile_rows,
                                          num_tiles=num_tiles,
                                          last_valid=last_valid)
        acc = pl.pallas_call(
            stats_kernel,
            out_shape=jax.ShapeDtypeStruct((8, _LANES), jnp.float32),
            grid_spec=pltpu.PrefetchScalarGridSpec(
                num_scalar_prefetch=0,
                grid=(num_tiles,),
                in_specs=[smem_spec, x_spec_1d, x_spec_1d],
                out_specs=pl.BlockSpec((8, _LANES), lambda t: (0, 0)),
            ),
            compiler_params=pltpu.CompilerParams(
                dimension_semantics=("arbitrary",),
                vmem_limit_bytes=vmem_limit,
            ),
            cost_estimate=pl.CostEstimate(
                flops=25 * batch_p, transcendentals=2 * batch_p,
                bytes_accessed=8 * batch_p),
        )(attn_p, x1p, x2p)

        mp = jnp.sum(acc[0:4, :], axis=1) * inv_b     # [mean_p0, E[p0^2], ...]
        s0 = lax.rsqrt(mp[1] - mp[0] * mp[0] + _BN_EPS) * raw_p[12]
        s1 = lax.rsqrt(mp[3] - mp[2] * mp[2] + _BN_EPS) * raw_p[13]
        c0 = s0 * raw_p[16]
        c1 = s1 * raw_p[17]
        d = ((raw_p[14] - mp[0] * s0) * raw_p[16]
             + (raw_p[15] - mp[2] * s1) * raw_p[17] + raw_p[18])
        apply_p = jnp.concatenate([attn_p, jnp.stack([c0, c1, d])])

        out = pl.pallas_call(
            _apply_kernel,
            out_shape=jax.ShapeDtypeStruct((rows_p, _LANES), jnp.float32),
            grid_spec=pltpu.PrefetchScalarGridSpec(
                num_scalar_prefetch=0,
                grid=(num_tiles,),
                in_specs=[smem_spec, x_spec_1d, x_spec_1d],
                out_specs=pl.BlockSpec((tile_rows, _LANES), lambda t: (t, 0)),
            ),
            compiler_params=pltpu.CompilerParams(
                dimension_semantics=("parallel",),     # tiles are independent
                vmem_limit_bytes=vmem_limit,
            ),
            cost_estimate=pl.CostEstimate(
                flops=30 * batch_p, transcendentals=3 * batch_p,
                bytes_accessed=12 * batch_p),
        )(apply_p, x1p, x2p)

    return out.reshape(batch_p)[:batch].reshape(batch, 1)


def self_attention_2d_points(x1, x2, params, *, max_tile_rows=1024, mode="auto"):
    """x1, x2: (B, 1) or (B,) float32; params: packed (19,) raw module params."""
    assert mode in ("auto", "fused", "streaming")
    x1f = jnp.asarray(x1, jnp.float32).reshape(-1)
    x2f = jnp.asarray(x2, jnp.float32).reshape(-1)
    batch = x1f.shape[0]
    assert x2f.shape[0] == batch

    rows = -(-batch // _LANES)                         # cdiv
    num_tiles = -(-rows // max(int(max_tile_rows), 8))
    tile_rows = _round_up(-(-rows // num_tiles), 8)    # even split, mult. of 8
    rows_p = num_tiles * tile_rows

    cap = _vmem_capacity_bytes()
    cache_bytes = 2 * rows_p * _LANES * 4              # p0/p1 VMEM cache
    block_bytes = 6 * tile_rows * _LANES * 4           # 2in x 2buf + 2 out buf
    needed = cache_bytes + block_bytes + 8 * _LANES * 4
    if mode == "auto":
        fused = needed <= int(cap * 0.7)
    else:
        fused = mode == "fused"
    if fused:
        vmem_limit = int(min(needed + (16 << 20), int(cap * 0.9)))
    else:
        vmem_limit = int(min(32 << 20, int(cap * 0.9)))

    return _forward(x1f, x2f, jnp.asarray(params, jnp.float32),
                    batch=batch, tile_rows=tile_rows, num_tiles=num_tiles,
                    fused=fused, vmem_limit=vmem_limit)


# --------------------------------------------------------------------------
# parameters & pure-JAX reference
# --------------------------------------------------------------------------
def make_params(key):
    """Deterministic parameter init mirroring the module's __init__ shapes."""
    k_inw, k_outw, k_fcw, k_fcb = jax.random.split(key, 4)
    g1 = jnp.ones((2,), jnp.float32)
    be1 = jnp.zeros((2,), jnp.float32)
    g2 = jnp.ones((2,), jnp.float32)
    be2 = jnp.zeros((2,), jnp.float32)
    in_proj_w = 0.5 * jax.random.normal(k_inw, (3,), jnp.float32)   # wq, wk, wv
    in_proj_b = jnp.zeros((3,), jnp.float32)                        # bq, bk, bv
    out_w = 0.5 * jax.random.normal(k_outw, (1,), jnp.float32)      # wo
    out_b = jnp.zeros((1,), jnp.float32)                            # bo
    fc_w = 0.5 * jax.random.normal(k_fcw, (2,), jnp.float32)        # wfc0, wfc1
    fc_b = 0.1 * jax.random.normal(k_fcb, (1,), jnp.float32)        # bfc
    packed = jnp.concatenate([
        g1[0:1], g1[1:2], be1[0:1], be1[1:2],
        in_proj_w, in_proj_b, out_w, out_b,
        g2[0:1], g2[1:2], be2[0:1], be2[1:2],
        fc_w, fc_b,
    ]).astype(jnp.float32)
    assert packed.shape == (19,)
    return packed


def reference(x1, x2, p):
    """Pure-JAX reference of the PyTorch forward (train-mode BatchNorm)."""
    g1 = jnp.array([p[0], p[1]])
    be1 = jnp.array([p[2], p[3]])
    wq, wk, wv, bq, bk, bv = p[4], p[5], p[6], p[7], p[8], p[9]
    wo, bo = p[10], p[11]
    g2 = jnp.array([p[12], p[13]])
    be2 = jnp.array([p[14], p[15]])
    fc_w = jnp.array([p[16], p[17]])
    bfc = p[18]

    x = jnp.concatenate([x1, x2], axis=-1)                       # (B, 2)
    mu = x.mean(0, keepdims=True)
    var = ((x - mu) ** 2).mean(0, keepdims=True)
    x = (x - mu) / jnp.sqrt(var + _BN_EPS) * g1 + be1
    x = x.reshape(-1, 2, 1)                                      # (B, L=2, E=1)
    q = x * wq + bq
    k = x * wk + bk
    v = x * wv + bv
    scores = jnp.einsum("bld,bmd->blm", q, k)                    # scale = 1
    attn = jax.nn.softmax(scores, axis=-1)
    out = jnp.einsum("blm,bmd->bld", attn, v) * wo + bo
    y = out.reshape(-1, 2)
    mu2 = y.mean(0, keepdims=True)
    var2 = ((y - mu2) ** 2).mean(0, keepdims=True)
    y = (y - mu2) / jnp.sqrt(var2 + _BN_EPS) * g2 + be2
    return jax.nn.sigmoid(y @ fc_w[:, None] + bfc)               # (B, 1)


if __name__ == "__main__":
    key = jax.random.PRNGKey(0)
    k_x1, k_x2, k_p = jax.random.split(key, 3)
    params = make_params(k_p)

    def check(out, ref, name):
        assert out.shape == ref.shape, (name, out.shape, ref.shape)
        err = float(jnp.max(jnp.abs(out - ref)))
        assert err < 1e-4, (name, err)

    # 1) batch not a multiple of 128 (padding + masked bn2 stats), fused path
    B = 1000
    x1 = jax.random.normal(k_x1, (B, 1), jnp.float32)
    x2 = jax.random.normal(k_x2, (B, 1), jnp.float32)
    out = jax.block_until_ready(self_attention_2d_points(x1, x2, params))
    check(out, reference(x1, x2, params), "fused_small")

    # 2) multi-tile fused path (small max_tile_rows forces several tiles)
    B2 = 40_000
    x1b = jax.random.normal(k_x1, (B2, 1), jnp.float32)
    x2b = jax.random.normal(k_x2, (B2, 1), jnp.float32)
    ref2 = reference(x1b, x2b, params)
    out2 = jax.block_until_ready(
        self_attention_2d_points(x1b, x2b, params, max_tile_rows=128))
    check(out2, ref2, "fused_multitile")

    # 3) streaming fallback (two pallas_calls), multi-tile
    out3 = jax.block_until_ready(
        self_attention_2d_points(x1b, x2b, params, max_tile_rows=128,
                                 mode="streaming"))
    check(out3, ref2, "streaming_multitile")

    # 4) the 3-point example from the original script
    x1c = jnp.array([[1.0], [2.0], [3.0]], jnp.float32)
    x2c = jnp.array([[2.0], [1.5], [1.0]], jnp.float32)
    out4 = jax.block_until_ready(self_attention_2d_points(x1c, x2c, params))
    check(out4, reference(x1c, x2c, params), "three_points")

    print("KERNEL_OK")
</pallas_src>

<mosaic_0001>
module attributes {stable_mosaic.version = 11 : i64} {
  func.func @kernel(%arg0: i32, %arg1: i32, %arg2: memref<21xf32, #tpu.memory_space<smem>>, %arg3: memref<8x128xf32, #tpu.memory_space<vmem>>, %arg4: memref<8x128xf32, #tpu.memory_space<vmem>>, %arg5: memref<8x128xf32, #tpu.memory_space<vmem>>, %arg6: memref<8x128xf32, #tpu.memory_space<vmem>>, %arg7: memref<8x128xf32, #tpu.memory_space<vmem>>, %arg8: memref<8x128xf32, #tpu.memory_space<vmem>>) attributes {dimension_semantics = [#tpu.dimension_semantics<arbitrary>, #tpu.dimension_semantics<arbitrary>], iteration_bounds = array<i64: 2, 1>, scalar_prefetch = 0 : i64, scratch_operands = 3 : i64, tpu.core_type = #tpu.core_type<tc>, window_params = [{transform_indices = @transform_0, window_bounds = array<i64: 21>}, {transform_indices = @transform_1, window_bounds = array<i64: 8, 128>}, {transform_indices = @transform_2, window_bounds = array<i64: 8, 128>}, {transform_indices = @transform_3, window_bounds = array<i64: 8, 128>}]} {
    %c8_i32 = arith.constant 8 : i32
    %0 = arith.muli %arg1, %c8_i32 : i32
    %1 = tpu.assume_multiple %0, 8 : i32
    %c0_i32 = arith.constant 0 : i32
    %2 = arith.cmpi eq, %arg0, %c0_i32 : i32
    %c0_i32_0 = arith.constant 0 : i32
    %3 = arith.cmpi eq, %arg1, %c0_i32_0 : i32
    %4 = arith.andi %2, %3 : i1
    %5 = arith.extui %4 : i1 to i32
    %c0_i32_1 = arith.constant 0 : i32
    %6 = arith.cmpi ne, %5, %c0_i32_1 : i32
    scf.if %6 {
      %cst = arith.constant 0.000000e+00 : f32
      %13 = vector.broadcast %cst : f32 to vector<8x128xf32>
      %c0 = arith.constant 0 : index
      %c0_5 = arith.constant 0 : index
      %14 = vector.load %arg6[%c0, %c0_5] : memref<8x128xf32, #tpu.memory_space<vmem>>, vector<8x128xf32>
      tpu.vector_store %arg6[%c0, %c0_5], %13 {strides = array<i32>} : memref<8x128xf32, #tpu.memory_space<vmem>>, vector<8x128xf32>,
    } else {
    }
    %c0_i32_2 = arith.constant 0 : i32
    %7 = arith.cmpi eq, %arg0, %c0_i32_2 : i32
    %8 = arith.extui %7 : i1 to i32
    %c0_i32_3 = arith.constant 0 : i32
    %9 = arith.cmpi ne, %8, %c0_i32_3 : i32
    scf.if %9 {
      %c0 = arith.constant 0 : index
      %c0_5 = arith.constant 0 : index
      %13 = vector.load %arg3[%c0, %c0_5] : memref<8x128xf32, #tpu.memory_space<vmem>>, vector<8x128xf32>
      %c0_6 = arith.constant 0 : index
      %c0_7 = arith.constant 0 : index
      %14 = vector.load %arg4[%c0_6, %c0_7] : memref<8x128xf32, #tpu.memory_space<vmem>>, vector<8x128xf32>
      %c0_8 = arith.constant 0 : index
      %15 = memref.load %arg2[%c0_8] : memref<21xf32, #tpu.memory_space<smem>>
      %16 = vector.broadcast %15 : f32 to vector<8x128xf32>
      %17 = arith.mulf %13, %16 : vector<8x128xf32>
      %c1 = arith.constant 1 : index
      %18 = memref.load %arg2[%c1] : memref<21xf32, #tpu.memory_space<smem>>
      %19 = vector.broadcast %18 : f32 to vector<8x128xf32>
      %20 = arith.addf %17, %19 : vector<8x128xf32>
      %c2 = arith.constant 2 : index
      %21 = memref.load %arg2[%c2] : memref<21xf32, #tpu.memory_space<smem>>
      %22 = vector.broadcast %21 : f32 to vector<8x128xf32>
      %23 = arith.mulf %14, %22 : vector<8x128xf32>
      %c3 = arith.constant 3 : index
      %24 = memref.load %arg2[%c3] : memref<21xf32, #tpu.memory_space<smem>>
      %25 = vector.broadcast %24 : f32 to vector<8x128xf32>
      %26 = arith.addf %23, %25 : vector<8x128xf32>
      %c4 = arith.constant 4 : index
      %27 = memref.load %arg2[%c4] : memref<21xf32, #tpu.memory_space<smem>>
      %28 = vector.broadcast %27 : f32 to vector<8x128xf32>
      %29 = arith.mulf %13, %28 : vector<8x128xf32>
      %c5 = arith.constant 5 : index
      %30 = memref.load %arg2[%c5] : memref<21xf32, #tpu.memory_space<smem>>
      %31 = vector.broadcast %30 : f32 to vector<8x128xf32>
      %32 = arith.mulf %14, %31 : vector<8x128xf32>
      %c6 = arith.constant 6 : index
      %33 = memref.load %arg2[%c6] : memref<21xf32, #tpu.memory_space<smem>>
      %34 = vector.broadcast %33 : f32 to vector<8x128xf32>
      %35 = arith.addf %32, %34 : vector<8x128xf32>
      %36 = arith.addf %29, %35 : vector<8x128xf32>
      %37 = arith.mulf %20, %36 : vector<8x128xf32>
      %38 = arith.negf %37 : vector<8x128xf32>
      %39 = math.exp %38 : vector<8x128xf32>
      %cst = arith.constant 1.000000e+00 : f32
      %40 = vector.broadcast %cst : f32 to vector<8x128xf32>
      %41 = arith.addf %40, %39 : vector<8x128xf32>
      %42 = arith.divf %40, %41 : vector<8x128xf32>
      %43 = arith.mulf %26, %36 : vector<8x128xf32>
      %44 = arith.negf %43 : vector<8x128xf32>
      %45 = math.exp %44 : vector<8x128xf32>
      %cst_9 = arith.constant 1.000000e+00 : f32
      %46 = vector.broadcast %cst_9 : f32 to vector<8x128xf32>
      %47 = arith.addf %46, %45 : vector<8x128xf32>
      %48 = arith.divf %46, %47 : vector<8x128xf32>
      %c7 = arith.constant 7 : index
      %49 = memref.load %arg2[%c7] : memref<21xf32, #tpu.memory_space<smem>>
      %50 = vector.broadcast %49 : f32 to vector<8x128xf32>
      %51 = arith.mulf %13, %50 : vector<8x128xf32>
      %c8 = arith.constant 8 : index
      %52 = memref.load %arg2[%c8] : memref<21xf32, #tpu.memory_space<smem>>
      %53 = vector.broadcast %52 : f32 to vector<8x128xf32>
      %54 = arith.mulf %14, %53 : vector<8x128xf32>
      %c9 = arith.constant 9 : index
      %55 = memref.load %arg2[%c9] : memref<21xf32, #tpu.memory_space<smem>>
      %56 = vector.broadcast %55 : f32 to vector<8x128xf32>
      %57 = arith.addf %54, %56 : vector<8x128xf32>
      %58 = arith.addf %51, %57 : vector<8x128xf32>
      %c10 = arith.constant 10 : index
      %59 = memref.load %arg2[%c10] : memref<21xf32, #tpu.memory_space<smem>>
      %60 = vector.broadcast %59 : f32 to vector<8x128xf32>
      %61 = arith.mulf %14, %60 : vector<8x128xf32>
      %c11 = arith.constant 11 : index
      %62 = memref.load %arg2[%c11] : memref<21xf32, #tpu.memory_space<smem>>
      %63 = vector.broadcast %62 : f32 to vector<8x128xf32>
      %64 = arith.addf %61, %63 : vector<8x128xf32>
      %65 = arith.mulf %42, %58 : vector<8x128xf32>
      %66 = arith.addf %64, %65 : vector<8x128xf32>
      %c12 = arith.constant 12 : index
      %67 = memref.load %arg2[%c12] : memref<21xf32, #tpu.memory_space<smem>>
      %68 = vector.broadcast %67 : f32 to vector<8x128xf32>
      %69 = arith.addf %61, %68 : vector<8x128xf32>
      %70 = arith.mulf %48, %58 : vector<8x128xf32>
      %71 = arith.addf %69, %70 : vector<8x128xf32>
      %72 = arith.index_cast %1 : i32 to index
      %c0_10 = arith.constant 0 : index
      %73 = vector.load %arg7[%72, %c0_10] : memref<8x128xf32, #tpu.memory_space<vmem>>, vector<8x128xf32>
      tpu.vector_store %arg7[%72, %c0_10], %66 {strides = array<i32>} : memref<8x128xf32, #tpu.memory_space<vmem>>, vector<8x128xf32>,
      %74 = arith.index_cast %1 : i32 to index
      %c0_11 = arith.constant 0 : index
      %75 = vector.load %arg8[%74, %c0_11] : memref<8x128xf32, #tpu.memory_space<vmem>>, vector<8x128xf32>
      tpu.vector_store %arg8[%74, %c0_11], %71 {strides = array<i32>} : memref<8x128xf32, #tpu.memory_space<vmem>>, vector<8x128xf32>,
      %c0_i32_12 = arith.constant 0 : i32
      %76 = arith.cmpi ne, %arg1, %c0_i32_12 : i32
      %77 = arith.extui %76 : i1 to i32
      %c0_i32_13 = arith.constant 0 : i32
      %78 = arith.cmpi ne, %77, %c0_i32_13 : i32
      scf.if %78 {
        %cst_16 = arith.constant dense<0.000000e+00> : vector<128xf32>
        %82 = vector.multi_reduction <add>, %66, %cst_16 [0] : vector<8x128xf32> to vector<128xf32>
        %83 = vector.shape_cast %82 : vector<128xf32> to vector<1x128xf32>
        %84 = arith.mulf %66, %66 : vector<8x128xf32>
        %cst_17 = arith.constant dense<0.000000e+00> : vector<128xf32>
        %85 = vector.multi_reduction <add>, %84, %cst_17 [0] : vector<8x128xf32> to vector<128xf32>
        %86 = vector.shape_cast %85 : vector<128xf32> to vector<1x128xf32>
        %cst_18 = arith.constant dense<0.000000e+00> : vector<128xf32>
        %87 = vector.multi_reduction <add>, %71, %cst_18 [0] : vector<8x128xf32> to vector<128xf32>
        %88 = vector.shape_cast %87 : vector<128xf32> to vector<1x128xf32>
        %89 = arith.mulf %71, %71 : vector<8x128xf32>
        %cst_19 = arith.constant dense<0.000000e+00> : vector<128xf32>
        %90 = vector.multi_reduction <add>, %89, %cst_19 [0] : vector<8x128xf32> to vector<128xf32>
        %91 = vector.shape_cast %90 : vector<128xf32> to vector<1x128xf32>
        %92 = tpu.concatenate %83, %86, %88, %91 in 0 : vector<1x128xf32>, vector<1x128xf32>, vector<1x128xf32>, vector<1x128xf32> -> vector<4x128xf32>
        %c0_20 = arith.constant 0 : index
        %c0_21 = arith.constant 0 : index
        %93 = vector.load %arg6[%c0_20, %c0_21] : memref<8x128xf32, #tpu.memory_space<vmem>>, vector<4x128xf32>
        %94 = arith.addf %93, %92 : vector<4x128xf32>
        %c0_22 = arith.constant 0 : index
        %c0_23 = arith.constant 0 : index
        %95 = vector.load %arg6[%c0_22, %c0_23] : memref<8x128xf32, #tpu.memory_space<vmem>>, vector<4x128xf32>
        tpu.vector_store %arg6[%c0_22, %c0_23], %94 {strides = array<i32>} : memref<8x128xf32, #tpu.memory_space<vmem>>, vector<4x128xf32>,
      } else {
      }
      %c0_i32_14 = arith.constant 0 : i32
      %79 = arith.cmpi eq, %arg1, %c0_i32_14 : i32
      %80 = arith.extui %79 : i1 to i32
      %c0_i32_15 = arith.constant 0 : i32
      %81 = arith.cmpi ne, %80, %c0_i32_15 : i32
      scf.if %81 {
        %82 = tpu.iota {dimensions = array<i32: 0>} : vector<8x128xi32>
        %c128_i32 = arith.constant 128 : i32
        %83 = vector.broadcast %c128_i32 : i32 to vector<8x128xi32>
        %84 = arith.muli %82, %83 : vector<8x128xi32>
        %85 = tpu.iota {dimensions = array<i32: 1>} : vector<8x128xi32>
        %86 = arith.addi %84, %85 : vector<8x128xi32>
        %c1000_i32 = arith.constant 1000 : i32
        %87 = vector.broadcast %c1000_i32 : i32 to vector<8x128xi32>
        %88 = arith.cmpi slt, %86, %87 : vector<8x128xi32>
        %cst_16 = arith.constant 0.000000e+00 : f32
        %89 = vector.broadcast %cst_16 : f32 to vector<8x128xf32>
        %90 = arith.select %88, %66, %89 : vector<8x128xi1>, vector<8x128xf32>
        %cst_17 = arith.constant 0.000000e+00 : f32
        %91 = vector.broadcast %cst_17 : f32 to vector<8x128xf32>
        %92 = arith.select %88, %71, %91 : vector<8x128xi1>, vector<8x128xf32>
        %cst_18 = arith.constant dense<0.000000e+00> : vector<128xf32>
        %93 = vector.multi_reduction <add>, %90, %cst_18 [0] : vector<8x128xf32> to vector<128xf32>
        %94 = vector.shape_cast %93 : vector<128xf32> to vector<1x128xf32>
        %95 = arith.mulf %90, %90 : vector<8x128xf32>
        %cst_19 = arith.constant dense<0.000000e+00> : vector<128xf32>
        %96 = vector.multi_reduction <add>, %95, %cst_19 [0] : vector<8x128xf32> to vector<128xf32>
        %97 = vector.shape_cast %96 : vector<128xf32> to vector<1x128xf32>
        %cst_20 = arith.constant dense<0.000000e+00> : vector<128xf32>
        %98 = vector.multi_reduction <add>, %92, %cst_20 [0] : vector<8x128xf32> to vector<128xf32>
        %99 = vector.shape_cast %98 : vector<128xf32> to vector<1x128xf32>
        %100 = arith.mulf %92, %92 : vector<8x128xf32>
        %cst_21 = arith.constant dense<0.000000e+00> : vector<128xf32>
        %101 = vector.multi_reduction <add>, %100, %cst_21 [0] : vector<8x128xf32> to vector<128xf32>
        %102 = vector.shape_cast %101 : vector<128xf32> to vector<1x128xf32>
        %103 = tpu.concatenate %94, %97, %99, %102 in 0 : vector<1x128xf32>, vector<1x128xf32>, vector<1x128xf32>, vector<1x128xf32> -> vector<4x128xf32>
        %c0_22 = arith.constant 0 : index
        %c0_23 = arith.constant 0 : index
        %104 = vector.load %arg6[%c0_22, %c0_23] : memref<8x128xf32, #tpu.memory_space<vmem>>, vector<4x128xf32>
        %105 = arith.addf %104, %103 : vector<4x128xf32>
        %c0_24 = arith.constant 0 : index
        %c0_25 = arith.constant 0 : index
        %106 = vector.load %arg6[%c0_24, %c0_25] : memref<8x128xf32, #tpu.memory_space<vmem>>, vector<4x128xf32>
        tpu.vector_store %arg6[%c0_24, %c0_25], %105 {strides = array<i32>} : memref<8x128xf32, #tpu.memory_space<vmem>>, vector<4x128xf32>,
      } else {
      }
    } else {
    }
    %c1_i32 = arith.constant 1 : i32
    %10 = arith.cmpi eq, %arg0, %c1_i32 : i32
    %11 = arith.extui %10 : i1 to i32
    %c0_i32_4 = arith.constant 0 : i32
    %12 = arith.cmpi ne, %11, %c0_i32_4 : i32
    scf.if %12 {
      %c0_i32_5 = arith.constant 0 : i32
      %13 = arith.cmpi eq, %arg1, %c0_i32_5 : i32
      %14 = arith.extui %13 : i1 to i32
      %c0_i32_6 = arith.constant 0 : i32
      %15 = arith.cmpi ne, %14, %c0_i32_6 : i32
      scf.if %15 {
        %c13 = arith.constant 13 : index
        %36 = memref.load %arg2[%c13] : memref<21xf32, #tpu.memory_space<smem>>
        %c0_13 = arith.constant 0 : index
        %c0_14 = arith.constant 0 : index
        %37 = vector.load %arg6[%c0_13, %c0_14] : memref<8x128xf32, #tpu.memory_space<vmem>>, vector<4x128xf32>
        %cst_15 = arith.constant dense<0.000000e+00> : vector<4xf32>
        %38 = vector.multi_reduction <add>, %37, %cst_15 [1] : vector<4x128xf32> to vector<4xf32>
        %39 = vector.shape_cast %38 : vector<4xf32> to vector<4x1xf32>
        %40 = vector.extract_strided_slice %39 {offsets = [0, 0], sizes = [1, 1], strides = [1, 1]} : vector<4x1xf32> to vector<1x1xf32>
        %41 = vector.broadcast %36 : f32 to vector<1x1xf32>
        %42 = arith.mulf %40, %41 : vector<1x1xf32>
        %43 = vector.extract_strided_slice %39 {offsets = [1, 0], sizes = [1, 1], strides = [1, 1]} : vector<4x1xf32> to vector<1x1xf32>
        %44 = vector.broadcast %36 : f32 to vector<1x1xf32>
        %45 = arith.mulf %43, %44 : vector<1x1xf32>
        %46 = vector.extract_strided_slice %39 {offsets = [2, 0], sizes = [1, 1], strides = [1, 1]} : vector<4x1xf32> to vector<1x1xf32>
        %47 = vector.broadcast %36 : f32 to vector<1x1xf32>
        %48 = arith.mulf %46, %47 : vector<1x1xf32>
        %49 = vector.extract_strided_slice %39 {offsets = [3, 0], sizes = [1, 1], strides = [1, 1]} : vector<4x1xf32> to vector<1x1xf32>
        %50 = vector.broadcast %36 : f32 to vector<1x1xf32>
        %51 = arith.mulf %49, %50 : vector<1x1xf32>
        %52 = arith.mulf %42, %42 : vector<1x1xf32>
        %53 = arith.subf %45, %52 : vector<1x1xf32>
        %cst_16 = arith.constant 9.99999974E-6 : f32
        %54 = vector.broadcast %cst_16 : f32 to vector<1x1xf32>
        %55 = arith.addf %53, %54 : vector<1x1xf32>
        %56 = math.rsqrt %55 : vector<1x1xf32>
        %c14 = arith.constant 14 : index
        %57 = memref.load %arg2[%c14] : memref<21xf32, #tpu.memory_space<smem>>
        %58 = vector.broadcast %57 : f32 to vector<1x1xf32>
        %59 = arith.mulf %56, %58 : vector<1x1xf32>
        %60 = arith.mulf %48, %48 : vector<1x1xf32>
        %61 = arith.subf %51, %60 : vector<1x1xf32>
        %cst_17 = arith.constant 9.99999974E-6 : f32
        %62 = vector.broadcast %cst_17 : f32 to vector<1x1xf32>
        %63 = arith.addf %61, %62 : vector<1x1xf32>
        %64 = math.rsqrt %63 : vector<1x1xf32>
        %c15 = arith.constant 15 : index
        %65 = memref.load %arg2[%c15] : memref<21xf32, #tpu.memory_space<smem>>
        %66 = vector.broadcast %65 : f32 to vector<1x1xf32>
        %67 = arith.mulf %64, %66 : vector<1x1xf32>
        %c18 = arith.constant 18 : index
        %68 = memref.load %arg2[%c18] : memref<21xf32, #tpu.memory_space<smem>>
        %69 = vector.broadcast %68 : f32 to vector<1x1xf32>
        %70 = arith.mulf %59, %69 : vector<1x1xf32>
        %c19 = arith.constant 19 : index
        %71 = memref.load %arg2[%c19] : memref<21xf32, #tpu.memory_space<smem>>
        %72 = vector.broadcast %71 : f32 to vector<1x1xf32>
        %73 = arith.mulf %67, %72 : vector<1x1xf32>
        %c16 = arith.constant 16 : index
        %74 = memref.load %arg2[%c16] : memref<21xf32, #tpu.memory_space<smem>>
        %75 = arith.mulf %42, %59 : vector<1x1xf32>
        %76 = vector.broadcast %74 : f32 to vector<1x1xf32>
        %77 = arith.subf %76, %75 : vector<1x1xf32>
        %c18_18 = arith.constant 18 : index
        %78 = memref.load %arg2[%c18_18] : memref<21xf32, #tpu.memory_space<smem>>
        %79 = vector.broadcast %78 : f32 to vector<1x1xf32>
        %80 = arith.mulf %77, %79 : vector<1x1xf32>
        %c17 = arith.constant 17 : index
        %81 = memref.load %arg2[%c17] : memref<21xf32, #tpu.memory_space<smem>>
        %82 = arith.mulf %48, %67 : vector<1x1xf32>
        %83 = vector.broadcast %81 : f32 to vector<1x1xf32>
        %84 = arith.subf %83, %82 : vector<1x1xf32>
        %c19_19 = arith.constant 19 : index
        %85 = memref.load %arg2[%c19_19] : memref<21xf32, #tpu.memory_space<smem>>
        %86 = vector.broadcast %85 : f32 to vector<1x1xf32>
        %87 = arith.mulf %84, %86 : vector<1x1xf32>
        %88 = arith.addf %80, %87 : vector<1x1xf32>
        %c20 = arith.constant 20 : index
        %89 = memref.load %arg2[%c20] : memref<21xf32, #tpu.memory_space<smem>>
        %90 = vector.broadcast %89 : f32 to vector<1x1xf32>
        %91 = arith.addf %88, %90 : vector<1x1xf32>
        %92 = vector.shape_cast %70 : vector<1x1xf32> to vector<1x1xf32>
        %93 = vector.broadcast %92 : vector<1x1xf32> to vector<1x128xf32>
        %c4_20 = arith.constant 4 : index
        %c0_21 = arith.constant 0 : index
        %94 = vector.load %arg6[%c4_20, %c0_21] : memref<8x128xf32, #tpu.memory_space<vmem>>, vector<1x128xf32>
        tpu.vector_store %arg6[%c4_20, %c0_21], %93 {strides = array<i32>} : memref<8x128xf32, #tpu.memory_space<vmem>>, vector<1x128xf32>,
        %95 = vector.shape_cast %73 : vector<1x1xf32> to vector<1x1xf32>
        %96 = vector.broadcast %95 : vector<1x1xf32> to vector<1x128xf32>
        %c5_22 = arith.constant 5 : index
        %c0_23 = arith.constant 0 : index
        %97 = vector.load %arg6[%c5_22, %c0_23] : memref<8x128xf32, #tpu.memory_space<vmem>>, vector<1x128xf32>
        tpu.vector_store %arg6[%c5_22, %c0_23], %96 {strides = array<i32>} : memref<8x128xf32, #tpu.memory_space<vmem>>, vector<1x128xf32>,
        %98 = vector.shape_cast %91 : vector<1x1xf32> to vector<1x1xf32>
        %99 = vector.broadcast %98 : vector<1x1xf32> to vector<1x128xf32>
        %c6_24 = arith.constant 6 : index
        %c0_25 = arith.constant 0 : index
        %100 = vector.load %arg6[%c6_24, %c0_25] : memref<8x128xf32, #tpu.memory_space<vmem>>, vector<1x128xf32>
        tpu.vector_store %arg6[%c6_24, %c0_25], %99 {strides = array<i32>} : memref<8x128xf32, #tpu.memory_space<vmem>>, vector<1x128xf32>,
      } else {
      }
      %c4 = arith.constant 4 : index
      %c0 = arith.constant 0 : index
      %16 = vector.load %arg6[%c4, %c0] : memref<8x128xf32, #tpu.memory_space<vmem>>, vector<1x128xf32>
      %c5 = arith.constant 5 : index
      %c0_7 = arith.constant 0 : index
      %17 = vector.load %arg6[%c5, %c0_7] : memref<8x128xf32, #tpu.memory_space<vmem>>, vector<1x128xf32>
      %c6 = arith.constant 6 : index
      %c0_8 = arith.constant 0 : index
      %18 = vector.load %arg6[%c6, %c0_8] : memref<8x128xf32, #tpu.memory_space<vmem>>, vector<1x128xf32>
      %19 = arith.index_cast %1 : i32 to index
      %c0_9 = arith.constant 0 : index
      %20 = vector.load %arg7[%19, %c0_9] : memref<8x128xf32, #tpu.memory_space<vmem>>, vector<8x128xf32>
      %21 = arith.index_cast %1 : i32 to index
      %c0_10 = arith.constant 0 : index
      %22 = vector.load %arg8[%21, %c0_10] : memref<8x128xf32, #tpu.memory_space<vmem>>, vector<8x128xf32>
      %23 = vector.broadcast %16 : vector<1x128xf32> to vector<8x128xf32>
      %24 = arith.mulf %20, %23 : vector<8x128xf32>
      %25 = vector.broadcast %17 : vector<1x128xf32> to vector<8x128xf32>
      %26 = arith.mulf %22, %25 : vector<8x128xf32>
      %27 = arith.addf %24, %26 : vector<8x128xf32>
      %28 = vector.broadcast %18 : vector<1x128xf32> to vector<8x128xf32>
      %29 = arith.addf %27, %28 : vector<8x128xf32>
      %30 = arith.negf %29 : vector<8x128xf32>
      %31 = math.exp %30 : vector<8x128xf32>
      %cst = arith.constant 1.000000e+00 : f32
      %32 = vector.broadcast %cst : f32 to vector<8x128xf32>
      %33 = arith.addf %32, %31 : vector<8x128xf32>
      %34 = arith.divf %32, %33 : vector<8x128xf32>
      %c0_11 = arith.constant 0 : index
      %c0_12 = arith.constant 0 : index
      %35 = vector.load %arg5[%c0_11, %c0_12] : memref<8x128xf32, #tpu.memory_space<vmem>>, vector<8x128xf32>
      tpu.vector_store %arg5[%c0_11, %c0_12], %34 {strides = array<i32>} : memref<8x128xf32, #tpu.memory_space<vmem>>, vector<8x128xf32>,
    } else {
    }
    return
  }
  func.func @transform_0(%arg0: i32, %arg1: i32) -> i32 {
    %c0_i32 = arith.constant 0 : i32
    %c0_i32_0 = arith.constant 0 : i32
    return %c0_i32 : i32
  }
  func.func @transform_1(%arg0: i32, %arg1: i32) -> (i32, i32) {
    %c1_i32 = arith.constant 1 : i32
    %0 = arith.subi %c1_i32, %arg0 : i32
    %1 = arith.muli %arg1, %0 : i32
    %c0_i32 = arith.constant 0 : i32
    %c0_i32_0 = arith.constant 0 : i32
    return %1, %c0_i32 : i32, i32
  }
  func.func @transform_2(%arg0: i32, %arg1: i32) -> (i32, i32) {
    %c1_i32 = arith.constant 1 : i32
    %0 = arith.subi %c1_i32, %arg0 : i32
    %1 = arith.muli %arg1, %0 : i32
    %c0_i32 = arith.constant 0 : i32
    %c0_i32_0 = arith.constant 0 : i32
    return %1, %c0_i32 : i32, i32
  }
  func.func @transform_3(%arg0: i32, %arg1: i32) -> (i32, i32) {
    %0 = arith.muli %arg1, %arg0 : i32
    %c0_i32 = arith.constant 0 : i32
    %c0_i32_0 = arith.constant 0 : i32
    return %0, %c0_i32 : i32, i32
  }
}

</mosaic_0001>

<bundles_post_ra>
// kernel: _forward.1
= control target key start
LH: loop header
LB: loop body
LE: loop exit
PB: predicated region body
PF: predicated region fallthrough
CT: control target
= control target key end

     0   :  { %8 = vsyncpa [#allocation7], 0  ;;  %s916_s0 = inlined_call_operand.vmem [shape: f32[21], index: 0, kind: input, shape index: {}]   ;;  %s917_s1 = inlined_call_operand.vmem [shape: f32[8,128], index: 1, kind: input, shape index: {}]   ;;  %s918_s2 = inlined_call_operand.vmem [shape: f32[8,128], index: 2, kind: input, shape index: {}]   ;;  %s919_s3 = inlined_call_operand.hbm [shape: f32[8,128], index: 3, kind: output, shape index: {}]  }
   0x1   :  { %9 = vsyncpa [#allocation6], 0 }
   0x2   :  { %11 = vsyncpa [#allocation6 + $0x1], 0  ;;  %s826_s12 = smov 0   ;;  %s828_s13 = smov 0  }
   0x3   :  { %s830_s14 = smov 0  }
   0x4 LB: > { %s621_s15 = sadd.s32 4294967295, %s800_s14   ;;  %s622_s16 = sadd.s32 4294967294, %s800_s14   ;;  %s800_s14 = sphi %s830_s14, %s17_s14   ;;  %s796_s13 = sphi %s828_s13, %s924_s13   ;;  %s792_s12 = sphi %s826_s12, %s923_s12  }
   0x5   : > { %s29_s17 = sadd.s32 1, %s796_s13  ;;  %p623_p0 = scmp.ge.s32.totalorder %s800_s14, 1 }
   0x6   : > { %p31_p1 = scmp.ge.s32.totalorder %s29_s17, 2  ;;  %p143_p2 = scmp.lt.s32.totalorder %s800_s14, 3 }
   0x7   : > { %p848_p3 = scmp.eq.s32.totalorder %s621_s15, 0  ;;  %s156_s22 = sshll.u32 %s916_s0, 4  ;;  %s157_s22 = int_to_ptr.vmem [resolvable:$true] %s156_s22 }
   0x8   : > { %s926_s17 = smov (%p31_p1, %s29_s17), 0  ;;  %p854_p4 = pnand %p623_p0, %p143_p2 }
   0x9   : > { %s729_s23 = scalar_lea.vmem %s157_s22, 16  ;;  %p737_p11 = scmp.lt.s32.totalorder %s157_s22, %s157_s22 }
   0xa   : > { %p672_p5 = pneg %p854_p4  ;;  %p730_p7 = scmp.ne.s32.totalorder %s157_s22, %s729_s23 }
   0xb   : > { %p738_p12 = scmp.lt.s32.totalorder %s729_s23, %s729_s23 }
   0xc   : > { %p673_p6 = pnand %p848_p3, %p672_p5 }
   0xd   : > { %p739_p13 = por %p738_p12, %p737_p11 }
   0xe   : > { %p731_p8 = pneg %p673_p6 }
  0x10   : > { %p732_p9 = pnand %p731_p8, %p730_p7 }
  0x12   : > { %p733_p10 = pneg %p732_p9 }
  0x14   : > { %p740_p0 = pnand %p739_p13, %p733_p10 }
  0x16   : > { %743 = shalt.err (!%p740_p0)
}
  0x17   : > { %s802_s24 = smov [#allocation5]   ;;  %191 = sbr.rel (%p854_p4) target bundleno = 487 (0x1e7), region = 32 }
  0x18   : > { %675 = dma.vmem_to_smem (!%p673_p6), %s157_s22, 16, %s802_s24, [#allocation7]  }
  0x1e   : > { %783 = dma.done.wait (%p848_p3), [#allocation7], 16  }
  0x1f   : > { %785 = vsyncadd (%p848_p3), [#allocation7], 4294967280 }
  0x20   : > { %197 = sfence }
  0x21   : > { %p241_p1 = scmp.eq.s32.totalorder %s792_s12, 0 }
  0x22   : > { %v803_v0 = vmov (%p241_p1), 0.0  }
  0x23   : > { %246 = sbr.rel (!%p241_p1) target bundleno = 42 (0x2a), region = 40  ;;  %247 = vst [vmem:[#allocation2] sm:$0xff] (%p241_p1), %v803_v0 }
  0x2a PF: > { %p631_p2 = scmp.ne.s32.totalorder %s792_s12, 0 }
  0x2b   : > { %s253_s25 = sld [smem:[#allocation5]] (!%p631_p2)  ;;  %s632_s26 = sld [smem:[#allocation5 + $0x1]] (!%p631_p2)  ;;  %v251_v1 = vld [vmem:[%s917_s1] sm:$0xff] (!%p631_p2)  ;;  %v358_v23 = vlaneseq (!%p631_p2)  ;;  %vm393_vm1 = vcmask (!%p631_p2), 1040384   ;;  %vm395_vm2 = vcmask (!%p631_p2), 1041408   ;;  %vm397_vm3 = vcmask (!%p631_p2), 1042432  }
  0x2c   : > { %250 = sbr.rel (%p631_p2) target bundleno = 112 (0x70), region = 44  ;;  %s633_s27 = sld [smem:[#allocation5 + $0x2]] (!%p631_p2)  ;;  %v252_v2 = vld [vmem:[%s918_s2] sm:$0xff] (!%p631_p2) }
  0x2d   : > { %s634_s28 = sld [smem:[#allocation5 + $0x3]] (!%p631_p2)  ;;  %s635_s29 = sld [smem:[#allocation5 + $0x4]] (!%p631_p2)  ;;  %v359_v31 = vshrl.u32 (!%p631_p2), %v358_v23, 7  ;;  %v362_v36 = vand.u32 (!%p631_p2), 127, %v358_v23 }
  0x2e   : > { %s636_s30 = sld [smem:[#allocation5 + $0x5]] (!%p631_p2)  ;;  %s637_s4 = sld [smem:[#allocation5 + $0x6]] (!%p631_p2) }
  0x2f   : > { %s641_s9 = sld [smem:[#allocation5 + $0x8]] (!%p631_p2)  ;;  %s640_s10 = sld [smem:[#allocation5 + $0x7]] (!%p631_p2)  ;;  %v360_v35 = vmul.u32 (!%p631_p2), 128, %v359_v31 }
  0x30   : > { %s642_s11 = sld [smem:[#allocation5 + $0x9]] (!%p631_p2)  ;;  %s643_s18 = sld [smem:[#allocation5 + $0xa]] (!%p631_p2) }
  0x31   : > { %v254_v3 = vstv (!%p631_p2), %s253_s25  ;;  %v257_v5 = vstv (!%p631_p2), %s632_s26  ;;  %s644_s19 = sld [smem:[#allocation5 + $0xb]] (!%p631_p2)  ;;  %s645_s20 = sld [smem:[#allocation5 + $0xc]] (!%p631_p2)  ;;  %v363_v41 = vadd.s32 (!%p631_p2), %v362_v36, %v360_v35 }
  0x32   : > { %v255_v4 = vmul.f32 (!%p631_p2), %v254_v3, %v251_v1  ;;  %v260_v6 = vstv (!%p631_p2), %s633_s27 }
  0x33   : > { %v261_v7 = vmul.f32 %v260_v6, %v252_v2  ;;  %v263_v8 = vstv %s634_s28  ;;  %v266_v9 = vstv %s635_s29  ;;  %vm364_vm0 = vcmp.lt.s32.totalorder %v363_v41, 1000 }
  0x34   : > { %v269_v10 = vstv %s636_s30  ;;  %v267_v11 = vmul.f32 %v266_v9, %v251_v1  ;;  %v272_v13 = vstv %s637_s4  ;;  %v258_v14 = vadd.f32 %v257_v5, %v255_v4 }
  0x35   : > { %v270_v12 = vmul.f32 %v269_v10, %v252_v2  ;;  %v264_v15 = vadd.f32 %v263_v8, %v261_v7  ;;  %v293_v22 = vstv %s641_s9  ;;  %v290_v29 = vstv %s640_s10 }
  0x36   : > { %v294_v27 = vmul.f32 %v293_v22, %v252_v2  ;;  %v296_v30 = vstv %s642_s11  ;;  %v300_v32 = vstv %s643_s18  ;;  %v291_v33 = vmul.f32 %v290_v29, %v251_v1 }
  0x37   : > { %v273_v16 = vadd.f32 %v272_v13, %v270_v12  ;;  %v301_v37 = vmul.f32 %v300_v32, %v252_v2  ;;  %v303_v38 = vstv %s644_s19  ;;  %v308_v40 = vstv %s645_s20 }
  0x38   : > { %v297_v34 = vadd.f32 %v296_v30, %v294_v27 }
  0x39   : > { %v274_v17 = vadd.f32 %v273_v16, %v267_v11  ;;  %v304_v42 = vadd.f32 %v303_v38, %v301_v37  ;;  %v309_v44 = vadd.f32 %v308_v40, %v301_v37 }
  0x3a   : > { %v298_v39 = vadd.f32 %v297_v34, %v291_v33 }
  0x3b   : > { %v275_v18 = vmul.f32 %v274_v17, %v258_v14  ;;  %v282_v19 = vmul.f32 %v274_v17, %v264_v15  ;;  %v399_v15 = vld [vmem:[#allocation2] sm:$0xf] }
  0x3d   : > { %v638_v20 = vmul.f32 -1.442695, %v275_v18  ;;  %v639_v21 = vmul.f32 -1.442695, %v282_v19 }
  0x3f   : > { %713 = vpow2.f32 %v638_v20 }
  0x40   : > { %715 = vpow2.f32 %v639_v21 }
  0x49   : > { %v714_v24 = vpop.eup %713 }
  0x4a   : > { %v716_v25 = vpop.eup %715  ;;  %v279_v26 = vadd.f32 1.0, %v714_v24 }
  0x4b   : > { %v286_v28 = vadd.f32 1.0, %v716_v25 }
  0x4c   : > { %717 = vrcp.f32 %v279_v26 }
  0x4d   : > { %719 = vrcp.f32 %v286_v28 }
  0x56   : > { %v718_v43 = vpop.eup %717 }
  0x57   : > { %v720_v45 = vpop.eup %719  ;;  %v305_v46 = vmul.f32 %v718_v43, %v298_v39 }
  0x58   : > { %v310_v47 = vmul.f32 %v720_v45, %v298_v39 }
  0x59   : > { %v306_v48 = vadd.f32 %v305_v46, %v304_v42 }
  0x5a   : > { %v311_v49 = vadd.f32 %v310_v47, %v309_v44 }
  0x5b   : > { %313 = vst [vmem:[#allocation3] sm:$0xff] %v306_v48  ;;  %v365_v50 = vsel %vm364_vm0, %v306_v48, 0.0 }
  0x5c   : > { %v367_v51 = vrot.slane %v365_v50, 4  ;;  %v373_v52 = vmul.f32 %v365_v50, %v365_v50  ;;  %315 = vst [vmem:[#allocation4] sm:$0xff] %v311_v49  ;;  %v366_v53 = vsel %vm364_vm0, %v311_v49, 0.0 }
  0x5d   : > { %v380_v54 = vrot.slane %v366_v53, 4  ;;  %v386_v55 = vmul.f32 %v366_v53, %v366_v53 }
  0x5e   : > { %v368_v56 = vadd.f32 %v367_v51, %v365_v50  ;;  %v374_v57 = vrot.slane %v373_v52, 4 }
  0x5f   : > { %v381_v58 = vadd.f32 %v380_v54, %v366_v53  ;;  %v387_v59 = vrot.slane %v386_v55, 4 }
  0x60   : > { %v369_v60 = vrot.slane %v368_v56, 2  ;;  %v375_v61 = vadd.f32 %v374_v57, %v373_v52 }
  0x61   : > { %v382_v62 = vrot.slane %v381_v58, 2  ;;  %v388_v63 = vadd.f32 %v387_v59, %v386_v55 }
  0x62   : > { %v370_v0 = vadd.f32 %v369_v60, %v368_v56  ;;  %v376_v1 = vrot.slane %v375_v61, 2 }
  0x63   : > { %v383_v2 = vadd.f32 %v382_v62, %v381_v58  ;;  %v389_v3 = vrot.slane %v388_v63, 2 }
  0x64   : > { %v371_v4 = vrot.slane %v370_v0, 1  ;;  %v377_v5 = vadd.f32 %v376_v1, %v375_v61 }
  0x65   : > { %v384_v6 = vrot.slane %v383_v2, 1  ;;  %v390_v7 = vadd.f32 %v389_v3, %v388_v63 }
  0x66   : > { %v372_v8 = vadd.f32 %v371_v4, %v370_v0  ;;  %v378_v9 = vrot.slane %v377_v5, 1 }
  0x67   : > { %v385_v10 = vadd.f32 %v384_v6, %v383_v2  ;;  %v391_v11 = vrot.slane %v390_v7, 1 }
  0x68   : > { %v379_v12 = vadd.f32 %v378_v9, %v377_v5 }
  0x69   : > { %v392_v13 = vadd.f32 %v391_v11, %v390_v7 }
  0x6a   : > { %v394_v14 = vsel %vm393_vm1, %v372_v8, %v379_v12 }
  0x6b   : > { %v396_v16 = vsel %vm395_vm2, %v394_v14, %v385_v10 }
  0x6c   : > { %v398_v17 = vsel %vm397_vm3, %v396_v16, %v392_v13 }
  0x6d   : > { %v400_v18 = vadd.f32 %v399_v15, %v398_v17 }
  0x6f   : > { %401 = vst [vmem:[#allocation2] sm:$0xf] %v400_v18 }
  0x70 PF: > { %p646_p3 = scmp.ne.s32.totalorder %s792_s12, 1 }
  0x71   : > { %vm411_vm4 = vcmask (!%p646_p3), 1043456   ;;  %v804_v21 = vmov (!%p646_p3), 0   ;;  %s647_s21 = sld [smem:[#allocation5 + $0xd]] (!%p646_p3)  ;;  %s649_s22 = sld [smem:[#allocation5 + $0xf]] (!%p646_p3)  ;;  %v483_v54 = vld [vmem:[#allocation4] sm:$0xff] (!%p646_p3)  ;;  %v481_v56 = vld [vmem:[#allocation3] sm:$0xff] (!%p646_p3) }
  0x72   : > { %405 = sbr.rel (%p646_p3) target bundleno = 464 (0x1d0), region = 56  ;;  %722 = vset.pattern.permute.xlu1 (!%p646_p3), %v804_v21  ;;  %721 = vset.pattern.permute.xlu0 (!%p646_p3), %v804_v21  ;;  %s648_s23 = sld [smem:[#allocation5 + $0xe]] (!%p646_p3) }
  0x73   : > { %s651_s12 = sld [smem:[#allocation5 + $0x13]] (!%p646_p3)  ;;  %s650_s24 = sld [smem:[#allocation5 + $0x12]] (!%p646_p3) }
  0x74   : > { %s653_s25 = sld [smem:[#allocation5 + $0x11]] (!%p646_p3)  ;;  %s652_s26 = sld [smem:[#allocation5 + $0x10]] (!%p646_p3) }
  0x75   : > { %s654_s27 = sld [smem:[#allocation5 + $0x14]] (!%p646_p3) }
  0x76   : > { %v410_v19 = vld [vmem:[#allocation2] sm:$0xf] (!%p646_p3) }
  0x77   : > { %v412_v20 = vsel (!%p646_p3), %vm411_vm4, %v410_v19, 0.0  ;;  %v415_v22 = vstv (!%p646_p3), %s647_s21  ;;  %v428_v29 = vstv (!%p646_p3), %s649_s22 }
  0x78   : > { %413 = vadd.xlane.f32.xlu0 (!%p646_p3), %v412_v20  ;;  %v425_v30 = vstv (!%p646_p3), %s648_s23 }
  0x79   : > { %v434_v32 = vstv %s651_s12  ;;  %v431_v33 = vstv %s650_s24 }
  0x7a   : > { %v449_v40 = vstv %s653_s25  ;;  %v441_v41 = vstv %s652_s26 }
  0x7b   : > { %v457_v49 = vstv %s654_s27 }
 0x105   : > { %v414_v23 = vpop.xlane.xlu0 %413 }
 0x106   : > { %v416_v24 = vmul.f32 %v415_v22, %v414_v23 }
 0x108   : > { %v417_v25 = vmul.f32 %v416_v24, %v416_v24 }
 0x10a   : > { %v419_v26 = vrot.slane %v417_v25, 7 }
 0x10c   : > { %v421_v27 = vsub.f32 %v416_v24, %v419_v26 }
 0x10e   : > { %v422_v28 = vadd.f32 1e-05, %v421_v27 }
 0x110   : > { %723 = vrsqrt.f32 %v422_v28 }
 0x11a   : > { %v724_v31 = vpop.eup %723 }
 0x11b   : > { %v429_v34 = vmul.f32 %v724_v31, %v428_v29  ;;  %v426_v35 = vmul.f32 %v724_v31, %v425_v30 }
 0x11d   : > { %v435_v36 = vmul.f32 %v434_v32, %v429_v34  ;;  %v446_v37 = vrot.slane %v429_v34, 1  ;;  %v432_v38 = vmul.f32 %v431_v33, %v426_v35  ;;  %v438_v39 = vrot.slane %v426_v35, 1 }
 0x11f   : > { %v448_v42 = vmul.f32 %v446_v37, %v416_v24  ;;  %467 = vperm.xlu1 %722, %v435_v36   ;;  %v440_v43 = vmul.f32 %v438_v39, %v416_v24  ;;  %461 = vperm.xlu0 %721, %v432_v38  }
 0x121   : > { %v450_v44 = vsub.f32 %v449_v40, %v448_v42  ;;  %v442_v45 = vsub.f32 %v441_v41, %v440_v43 }
 0x123   : > { %v451_v46 = vmul.f32 %v450_v44, %v434_v32  ;;  %v443_v48 = vmul.f32 %v442_v45, %v431_v33 }
 0x125   : > { %v453_v47 = vrot.slane %v451_v46, 2 }
 0x127   : > { %v455_v50 = vadd.f32 %v453_v47, %v443_v48 }
 0x129   : > { %v458_v51 = vadd.f32 %v457_v49, %v455_v50 }
 0x12b   : > { %473 = vperm.xlu1 %722, %v458_v51  }
 0x19e   : > { %v468_v52 = vpop.permute.xlu1 %467  ;;  %v462_v53 = vpop.permute.xlu0 %461 }
 0x19f   : > { %470 = vst [vmem:[#allocation2 + $0x2] sm:$0x8] %v468_v52  ;;  %464 = vst [vmem:[#allocation2 + $0x3] sm:$0x2] %v462_v53 }
 0x1a6   : > { %v656_v55 = vld [vmem:[#allocation2 + $0x5] ss:$0 sm:$0xff]  ;;  %v655_v57 = vld [vmem:[#allocation2 + $0x4] ss:$0 sm:$0xff] }
 0x1a7   : > { %v493_v59 = vmul.f32 %v656_v55, %v483_v54  ;;  %v488_v60 = vmul.f32 %v655_v57, %v481_v56 }
 0x1a9   : > { %v494_v61 = vadd.f32 %v493_v59, %v488_v60 }
 0x1aa   : > { %v474_v58 = vpop.permute.xlu1 %473 }
 0x1ab   : > { %476 = vst [vmem:[#allocation2 + $0x6] sm:$0x1] %v474_v58 }
 0x1b2   : > { %v657_v62 = vld [vmem:[#allocation2 + $0x6] ss:$0 sm:$0xff] }
 0x1b3   : > { %v499_v63 = vadd.f32 %v657_v62, %v494_v61 }
 0x1b5   : > { %v658_v0 = vmul.f32 -1.442695, %v499_v63 }
 0x1b7   : > { %725 = vpow2.f32 %v658_v0 }
 0x1c1   : > { %v726_v1 = vpop.eup %725 }
 0x1c2   : > { %v503_v2 = vadd.f32 1.0, %v726_v1 }
 0x1c4   : > { %727 = vrcp.f32 %v503_v2 }
 0x1ce   : > { %v728_v3 = vpop.eup %727 }
 0x1cf   : > { %506 = vst [vmem:[#allocation8] sm:$0xff] %v728_v3 }
 0x1d0 PF: > { %p882_p4 = scmp.eq.s32.totalorder %s621_s15, 1  ;;  %s805_s29 = smov [#allocation8]  }
 0x1d1   : > { %s522_s30 = sshll.u32 %s805_s29, 4  ;;  %s523_s30 = int_to_ptr.vmem [resolvable:$true] %s522_s30 }
 0x1d2   : > { %s744_s4 = scalar_lea.vmem %s523_s30, 128  ;;  %s750_s5 = scalar_lea.vmem %s523_s30, 256 }
 0x1d3   : > { %p745_p5 = scmp.ne.s32.totalorder %s523_s30, %s744_s4  ;;  %p751_p8 = scmp.lt.s32.totalorder %s523_s30, %s523_s30 }
 0x1d4   : > { %p752_p9 = scmp.lt.s32.totalorder %s750_s5, %s744_s4 }
 0x1d5   : > { %p746_p6 = pnand %p745_p5, %p882_p4 }
 0x1d6   : > { %p753_p10 = por %p752_p9, %p751_p8 }
 0x1d7   : > { %p747_p7 = pneg %p746_p6 }
 0x1d9   : > { %p754_p11 = pnand %p753_p10, %p747_p7 }
 0x1db   : > { %757 = shalt.err (!%p754_p11)
}
 0x1dc   : > { %s758_s7 = scalar_lea.hbm %s919_s3, 128 }
 0x1dd   : > { %p759_p12 = scmp.ne.s32.totalorder %s919_s3, %s758_s7  ;;  %p764_p1 = scmp.lt.u32.totalorder %s758_s7, %s919_s3 }
 0x1df   : > { %p760_p13 = pnand %p759_p12, %p882_p4 }
 0x1e1   : > { %p761_p0 = pneg %p760_p13 }
 0x1e3   : > { %p766_p2 = pnand %p764_p1, %p761_p0 }
 0x1e5   : > { %769 = shalt.err (!%p766_p2)
}
 0x1e6   : > { %669 = dma.vmem_to_hbm [thread:$0]  (%p882_p4), %s523_s30, 128, %s919_s3, [#allocation6]  }
 0x1e7 PF: > { %p683_p3 = scmp.ge.s32.totalorder %s800_s14, 2  ;;  %p684_p5 = scmp.eq.s32.totalorder %s622_s16, 1 }
 0x1e9   : > { %p677_p6 = pnand %p684_p5, %p683_p3 }
 0x1eb   : > { %787 = dma.done.wait (!%p677_p6), [#allocation6], 128  }
 0x1ec   : > { %789 = vsyncadd (!%p677_p6), [#allocation6], 4294967168  ;;  %s17_s14 = sadd.s32 1, %s800_s14   ;;  %s923_s12 = smov %s796_s13 }
 0x1ed   : > { %p14_p7 = scmp.ge.s32.totalorder %s17_s14, 4   ;;  %s924_s13 = smov %s926_s17 }
 0x1ef   :  { %16 = sbr.rel (!%p14_p7) target bundleno = 4 (0x4), region = 103 }
 0x1f6   :  { %540 = vsyncpa [#allocation6], 1 }
 0x1f7   :  { %542 = vsyncpa [#allocation6 + $0x1], 1 }
 0x1f8   :  { %543 = vsyncpa [#allocation7], 1 }
 0x1f9   :  { %545 = vsyncpa [#allocation7 + $0x1], 1 }

</bundles_post_ra>
